<compile_context>
chip_gen: v7x
topology: tpu7x:2x2x1
jax: 0.10.0
libtpu: 0.0.40
codegen_flags: <defaults>
</compile_context>

<pallas_src>
import functools

import jax
import jax.numpy as jnp
from jax.experimental import pallas as pl
from jax.experimental.pallas import tpu as pltpu

IN_DIM = 28 * 28          # 784 (block last-dim == full array dim -> legal)
H1 = 128
H2 = 64
H2_PAD = 128              # fc2 output padded to a full lane group
OUT = 10
OUT_PAD = 128             # fc3 output padded for unmasked, lane-dense stores
NEG = -1e30               # "minus infinity" for padded logits (finite => no NaN)


def _mlp_kernel(x_ref, w1_ref, b1_ref, w2_ref, b2_ref, w3_ref, b3_ref, o_ref):
    # x tile: (bt, 784) f32 straight from HBM; cast to bf16 in VMEM (MXU dtype).
    x = x_ref[...].astype(jnp.bfloat16)

    h1 = jnp.dot(x, w1_ref[...], preferred_element_type=jnp.float32)        # (bt, 128)
    h1 = jnp.maximum(h1 + b1_ref[...], 0.0).astype(jnp.bfloat16)

    h2 = jnp.dot(h1, w2_ref[...], preferred_element_type=jnp.float32)       # (bt, 128)
    h2 = jnp.maximum(h2 + b2_ref[...], 0.0).astype(jnp.bfloat16)

    logits = jnp.dot(h2, w3_ref[...], preferred_element_type=jnp.float32)   # (bt, 128)
    logits = logits + b3_ref[...]          # padded classes get -1e30 -> exp() == 0

    # Numerically stable log_softmax over the (padded) class axis.
    m = jnp.max(logits, axis=-1, keepdims=True)
    shifted = logits - m
    lse = jnp.log(jnp.sum(jnp.exp(shifted), axis=-1, keepdims=True))
    o_ref[...] = (shifted - lse).astype(o_ref.dtype)


def prepare_params(params):
    """One-time pad/cast of the raw (f32, torch-layout) params.

    Call once and reuse the result; weights become bf16 (MXU dtype) and are
    padded to lane-aligned widths.  Biases stay f32.
    """
    w1, b1, w2, b2, w3, b3 = params
    w1p = w1.astype(jnp.bfloat16)                                                  # (784, 128)
    b1p = b1.astype(jnp.float32)                                                   # (1, 128)
    w2p = jnp.pad(w2, ((0, 0), (0, H2_PAD - H2))).astype(jnp.bfloat16)             # (128, 128)
    b2p = jnp.pad(b2, ((0, 0), (0, H2_PAD - H2))).astype(jnp.float32)              # (1, 128)
    w3p = jnp.pad(w3, ((0, H2_PAD - H2), (0, OUT_PAD - OUT))).astype(jnp.bfloat16)  # (128, 128)
    b3p = jnp.pad(b3, ((0, 0), (0, OUT_PAD - OUT)),
                  constant_values=NEG).astype(jnp.float32)                         # (1, 128)
    return w1p, b1p, w2p, b2p, w3p, b3p


def _round_up(x, m):
    return ((x + m - 1) // m) * m


def _cdiv(a, b):
    return -(-a // b)


def _choose_bt(B, block_b):
    """Pick the batch tile size (static, from shapes only)."""
    if B <= 32:
        # Tiny batch: a single block whose batch dim equals the array dim
        # (always a legal BlockSpec, no divisibility constraint).
        return B
    # >= 2 tiles so v7x's two TensorCores both get work ("parallel" grid axis);
    # round to 16 rows (bf16 sublane packing of the casted tile), cap at block_b.
    bt = min(block_b, _round_up(_cdiv(B, 2), 16))
    # Even out tiles to minimize the masked tail of the last (partial) tile.
    n_tiles = _cdiv(B, bt)
    bt = min(block_b, _round_up(_cdiv(B, n_tiles), 16))
    return bt


@functools.partial(jax.jit, static_argnames=("block_b", "out_dtype"))
def net_forward(x_nchw, padded_params, block_b=1024, out_dtype=jnp.bfloat16):
    """Forward pass matching Net.forward.

    x_nchw: (B, 1, 28, 28) float32.  padded_params: output of prepare_params.
    Returns (B, 10) log-probabilities (bf16 by default; pass out_dtype=f32 for
    tighter parity with the f32 PyTorch reference).
    """
    B = x_nchw.shape[0]
    x = x_nchw.reshape(B, IN_DIM)          # contiguous view; stays f32 in HBM

    w1p, b1p, w2p, b2p, w3p, b3p = padded_params

    bt = _choose_bt(B, block_b)
    n_tiles = _cdiv(B, bt)

    flops = 2 * n_tiles * bt * (IN_DIM * H1 + H1 * H2_PAD + H2_PAD * OUT_PAD)
    bytes_accessed = (B * IN_DIM * 4                               # f32 activations in
                      + (w1p.size + w2p.size + w3p.size) * 2       # bf16 weights
                      + (b1p.size + b2p.size + b3p.size) * 4       # f32 biases
                      + B * OUT_PAD * jnp.dtype(out_dtype).itemsize)

    const = lambda arr: pl.BlockSpec(arr.shape, lambda i: (0, 0))  # resident weights

    out = pl.pallas_call(
        _mlp_kernel,
        out_shape=jax.ShapeDtypeStruct((B, OUT_PAD), out_dtype),
        grid=(n_tiles,),
        in_specs=[
            # Batch-tiled f32 input; partial last tile is handled by Pallas
            # boundary masking (garbage rows never reach valid output rows).
            # On v7x one may experiment with pipeline_mode=pl.Buffered(3) here.
            pl.BlockSpec((bt, IN_DIM), lambda i: (i, 0)),
            const(w1p), const(b1p),
            const(w2p), const(b2p),
            const(w3p), const(b3p),
        ],
        out_specs=pl.BlockSpec((bt, OUT_PAD), lambda i: (i, 0)),
        compiler_params=pltpu.CompilerParams(
            dimension_semantics=("parallel",),          # megacore split on v7x
            vmem_limit_bytes=32 * 1024 * 1024),         # safe margin on v5e too
        cost_estimate=pl.CostEstimate(
            flops=flops,
            transcendentals=n_tiles * bt * (OUT_PAD + 1),
            bytes_accessed=int(bytes_accessed)),
    )(x, w1p, b1p, w2p, b2p, w3p, b3p)

    # Only the cheap column slice remains (rows already exact); fuses under jit.
    return out[:, :OUT]


def init_params(key):
    """Deterministic init mimicking torch.nn.Linear (uniform +/- 1/sqrt(fan_in)).
    Weights stored as (in_features, out_features)."""
    dims = [(IN_DIM, H1), (H1, H2), (H2, OUT)]
    params = []
    for (fan_in, fan_out) in dims:
        key, kw, kb = jax.random.split(key, 3)
        bound = 1.0 / (fan_in ** 0.5)
        w = jax.random.uniform(kw, (fan_in, fan_out), jnp.float32, -bound, bound)
        b = jax.random.uniform(kb, (1, fan_out), jnp.float32, -bound, bound)
        params += [w, b]
    return tuple(params)


def _reference(x_nchw, params):
    """Plain-JAX reference mirroring the kernel's bf16 matmul / f32 accumulate."""
    w1, b1, w2, b2, w3, b3 = params
    x = x_nchw.reshape(x_nchw.shape[0], -1).astype(jnp.bfloat16)
    h1 = jnp.maximum(
        jnp.dot(x, w1.astype(jnp.bfloat16), preferred_element_type=jnp.float32) + b1, 0.0)
    h2 = jnp.maximum(
        jnp.dot(h1.astype(jnp.bfloat16), w2.astype(jnp.bfloat16),
                preferred_element_type=jnp.float32) + b2, 0.0)
    logits = jnp.dot(h2.astype(jnp.bfloat16), w3.astype(jnp.bfloat16),
                     preferred_element_type=jnp.float32) + b3
    return jax.nn.log_softmax(logits, axis=1)


if __name__ == "__main__":
    key = jax.random.PRNGKey(0)
    key, kx = jax.random.split(key)
    params = init_params(key)
    padded = prepare_params(params)   # pad/cast weights once, reuse every call

    # Small MNIST-shaped batch (module spec: B x 1 x 28 x 28).
    x_small = jax.random.normal(kx, (2, 1, 28, 28), jnp.float32)
    out_small = jax.block_until_ready(net_forward(x_small, padded))
    assert out_small.shape == (2, OUT)
    ref_small = _reference(x_small, params)
    assert jnp.allclose(out_small.astype(jnp.float32), ref_small,
                        atol=2e-2, rtol=2e-2), \
        float(jnp.max(jnp.abs(out_small.astype(jnp.float32) - ref_small)))

    # Larger, non-tile-multiple batch to exercise the multi-tile / partial-tail path.
    key, kx2 = jax.random.split(key)
    x_big = jax.random.normal(kx2, (300, 1, 28, 28), jnp.float32)
    out_big = jax.block_until_ready(net_forward(x_big, padded))
    assert out_big.shape == (300, OUT)
    ref_big = _reference(x_big, params)
    assert jnp.allclose(out_big.astype(jnp.float32), ref_big,
                        atol=2e-2, rtol=2e-2), \
        float(jnp.max(jnp.abs(out_big.astype(jnp.float32) - ref_big)))

    print("KERNEL_OK")
</pallas_src>

<mosaic_0001>
module attributes {stable_mosaic.version = 11 : i64} {
  func.func @_mlp_kernel(%arg0: i32, %arg1: memref<2x784xf32, #tpu.memory_space<vmem>>, %arg2: memref<784x128xbf16, #tpu.memory_space<vmem>>, %arg3: memref<1x128xf32, #tpu.memory_space<vmem>>, %arg4: memref<128x128xbf16, #tpu.memory_space<vmem>>, %arg5: memref<1x128xf32, #tpu.memory_space<vmem>>, %arg6: memref<128x128xbf16, #tpu.memory_space<vmem>>, %arg7: memref<1x128xf32, #tpu.memory_space<vmem>>, %arg8: memref<2x128xbf16, #tpu.memory_space<vmem>>) attributes {dimension_semantics = [#tpu.dimension_semantics<parallel>], iteration_bounds = array<i64: 1>, scalar_prefetch = 0 : i64, scratch_operands = 0 : i64, tpu.core_type = #tpu.core_type<tc>, window_params = [{transform_indices = @transform_0, window_bounds = array<i64: 2, 784>}, {pipeline_mode = #tpu.pipeline_mode<synchronous>, transform_indices = @transform_1, window_bounds = array<i64: 784, 128>}, {pipeline_mode = #tpu.pipeline_mode<synchronous>, transform_indices = @transform_2, window_bounds = array<i64: 1, 128>}, {pipeline_mode = #tpu.pipeline_mode<synchronous>, transform_indices = @transform_3, window_bounds = array<i64: 128, 128>}, {pipeline_mode = #tpu.pipeline_mode<synchronous>, transform_indices = @transform_4, window_bounds = array<i64: 1, 128>}, {pipeline_mode = #tpu.pipeline_mode<synchronous>, transform_indices = @transform_5, window_bounds = array<i64: 128, 128>}, {pipeline_mode = #tpu.pipeline_mode<synchronous>, transform_indices = @transform_6, window_bounds = array<i64: 1, 128>}, {transform_indices = @transform_7, window_bounds = array<i64: 2, 128>}]} {
    %c0 = arith.constant 0 : index
    %c0_0 = arith.constant 0 : index
    %0 = vector.load %arg1[%c0, %c0_0] : memref<2x784xf32, #tpu.memory_space<vmem>>, vector<2x784xf32>
    %1 = arith.truncf %0 : vector<2x784xf32> to vector<2x784xbf16>
    %c0_1 = arith.constant 0 : index
    %c0_2 = arith.constant 0 : index
    %2 = vector.load %arg2[%c0_1, %c0_2] : memref<784x128xbf16, #tpu.memory_space<vmem>>, vector<784x128xbf16>
    %cst = arith.constant dense<0.000000e+00> : vector<2x128xf32>
    %3 = tpu.matmul %1, %2, %cst {dimension_numbers = #tpu.dot_dimension_numbers<[1], [0], [0], [1], [0, 0, 1, 1], [], []>} : vector<2x784xbf16>, vector<784x128xbf16>, vector<2x128xf32> -> vector<2x128xf32>
    %c0_3 = arith.constant 0 : index
    %c0_4 = arith.constant 0 : index
    %4 = vector.load %arg3[%c0_3, %c0_4] : memref<1x128xf32, #tpu.memory_space<vmem>>, vector<1x128xf32>
    %5 = vector.broadcast %4 : vector<1x128xf32> to vector<2x128xf32>
    %6 = arith.addf %3, %5 : vector<2x128xf32>
    %cst_5 = arith.constant 0.000000e+00 : f32
    %7 = vector.broadcast %cst_5 : f32 to vector<2x128xf32>
    %8 = arith.maximumf %6, %7 : vector<2x128xf32>
    %9 = arith.truncf %8 : vector<2x128xf32> to vector<2x128xbf16>
    %c0_6 = arith.constant 0 : index
    %c0_7 = arith.constant 0 : index
    %10 = vector.load %arg4[%c0_6, %c0_7] : memref<128x128xbf16, #tpu.memory_space<vmem>>, vector<128x128xbf16>
    %cst_8 = arith.constant dense<0.000000e+00> : vector<2x128xf32>
    %11 = tpu.matmul %9, %10, %cst_8 {dimension_numbers = #tpu.dot_dimension_numbers<[1], [0], [0], [1], [0, 0, 1, 1], [], []>} : vector<2x128xbf16>, vector<128x128xbf16>, vector<2x128xf32> -> vector<2x128xf32>
    %c0_9 = arith.constant 0 : index
    %c0_10 = arith.constant 0 : index
    %12 = vector.load %arg5[%c0_9, %c0_10] : memref<1x128xf32, #tpu.memory_space<vmem>>, vector<1x128xf32>
    %13 = vector.broadcast %12 : vector<1x128xf32> to vector<2x128xf32>
    %14 = arith.addf %11, %13 : vector<2x128xf32>
    %cst_11 = arith.constant 0.000000e+00 : f32
    %15 = vector.broadcast %cst_11 : f32 to vector<2x128xf32>
    %16 = arith.maximumf %14, %15 : vector<2x128xf32>
    %17 = arith.truncf %16 : vector<2x128xf32> to vector<2x128xbf16>
    %c0_12 = arith.constant 0 : index
    %c0_13 = arith.constant 0 : index
    %18 = vector.load %arg6[%c0_12, %c0_13] : memref<128x128xbf16, #tpu.memory_space<vmem>>, vector<128x128xbf16>
    %cst_14 = arith.constant dense<0.000000e+00> : vector<2x128xf32>
    %19 = tpu.matmul %17, %18, %cst_14 {dimension_numbers = #tpu.dot_dimension_numbers<[1], [0], [0], [1], [0, 0, 1, 1], [], []>} : vector<2x128xbf16>, vector<128x128xbf16>, vector<2x128xf32> -> vector<2x128xf32>
    %c0_15 = arith.constant 0 : index
    %c0_16 = arith.constant 0 : index
    %20 = vector.load %arg7[%c0_15, %c0_16] : memref<1x128xf32, #tpu.memory_space<vmem>>, vector<1x128xf32>
    %21 = vector.broadcast %20 : vector<1x128xf32> to vector<2x128xf32>
    %22 = arith.addf %19, %21 : vector<2x128xf32>
    %cst_17 = arith.constant dense<0xFF800000> : vector<2xf32>
    %23 = vector.multi_reduction <maximumf>, %22, %cst_17 [1] : vector<2x128xf32> to vector<2xf32>
    %24 = vector.shape_cast %23 : vector<2xf32> to vector<2x1xf32>
    %25 = vector.broadcast %24 : vector<2x1xf32> to vector<2x128xf32>
    %26 = arith.subf %22, %25 : vector<2x128xf32>
    %27 = math.exp %26 : vector<2x128xf32>
    %cst_18 = arith.constant dense<0.000000e+00> : vector<2xf32>
    %28 = vector.multi_reduction <add>, %27, %cst_18 [1] : vector<2x128xf32> to vector<2xf32>
    %29 = vector.shape_cast %28 : vector<2xf32> to vector<2x1xf32>
    %30 = math.log %29 : vector<2x1xf32>
    %31 = vector.broadcast %30 : vector<2x1xf32> to vector<2x128xf32>
    %32 = arith.subf %26, %31 : vector<2x128xf32>
    %33 = arith.truncf %32 : vector<2x128xf32> to vector<2x128xbf16>
    %c0_19 = arith.constant 0 : index
    %c0_20 = arith.constant 0 : index
    %34 = vector.load %arg8[%c0_19, %c0_20] : memref<2x128xbf16, #tpu.memory_space<vmem>>, vector<2x128xbf16>
    tpu.vector_store %arg8[%c0_19, %c0_20], %33 {strides = array<i32>} : memref<2x128xbf16, #tpu.memory_space<vmem>>, vector<2x128xbf16>,
    return
  }
  func.func @transform_0(%arg0: i32) -> (i32, i32) {
    %c0_i32 = arith.constant 0 : i32
    %c0_i32_0 = arith.constant 0 : i32
    return %arg0, %c0_i32 : i32, i32
  }
  func.func @transform_1(%arg0: i32) -> (i32, i32) {
    %c0_i32 = arith.constant 0 : i32
    %c0_i32_0 = arith.constant 0 : i32
    %c0_i32_1 = arith.constant 0 : i32
    return %c0_i32, %c0_i32_0 : i32, i32
  }
  func.func @transform_2(%arg0: i32) -> (i32, i32) {
    %c0_i32 = arith.constant 0 : i32
    %c0_i32_0 = arith.constant 0 : i32
    %c0_i32_1 = arith.constant 0 : i32
    return %c0_i32, %c0_i32_0 : i32, i32
  }
  func.func @transform_3(%arg0: i32) -> (i32, i32) {
    %c0_i32 = arith.constant 0 : i32
    %c0_i32_0 = arith.constant 0 : i32
    %c0_i32_1 = arith.constant 0 : i32
    return %c0_i32, %c0_i32_0 : i32, i32
  }
  func.func @transform_4(%arg0: i32) -> (i32, i32) {
    %c0_i32 = arith.constant 0 : i32
    %c0_i32_0 = arith.constant 0 : i32
    %c0_i32_1 = arith.constant 0 : i32
    return %c0_i32, %c0_i32_0 : i32, i32
  }
  func.func @transform_5(%arg0: i32) -> (i32, i32) {
    %c0_i32 = arith.constant 0 : i32
    %c0_i32_0 = arith.constant 0 : i32
    %c0_i32_1 = arith.constant 0 : i32
    return %c0_i32, %c0_i32_0 : i32, i32
  }
  func.func @transform_6(%arg0: i32) -> (i32, i32) {
    %c0_i32 = arith.constant 0 : i32
    %c0_i32_0 = arith.constant 0 : i32
    %c0_i32_1 = arith.constant 0 : i32
    return %c0_i32, %c0_i32_0 : i32, i32
  }
  func.func @transform_7(%arg0: i32) -> (i32, i32) {
    %c0_i32 = arith.constant 0 : i32
    %c0_i32_0 = arith.constant 0 : i32
    return %arg0, %c0_i32 : i32, i32
  }
}

</mosaic_0001>

<bundles_post_ra>
// kernel: net_forward.1
= control target key start
LH: loop header
LB: loop body
LE: loop exit
PB: predicated region body
PF: predicated region fallthrough
CT: control target
= control target key end

     0   :  { %12 = vsyncpa [#allocation3], 0  ;;  %s1397_s0 = inlined_call_operand.vmem [shape: f32[2,784], index: 0, kind: input, shape index: {}]   ;;  %s1398_s1 = inlined_call_operand.hbm [shape: bf16[784,128], index: 1, kind: input, shape index: {}]   ;;  %s1399_s2 = inlined_call_operand.vmem [shape: f32[1,128], index: 2, kind: input, shape index: {}]   ;;  %s1400_s3 = inlined_call_operand.vmem [shape: bf16[128,128], index: 3, kind: input, shape index: {}]   ;;  %s1401_s4 = inlined_call_operand.vmem [shape: f32[1,128], index: 4, kind: input, shape index: {}]   ;;  %s1402_s5 = inlined_call_operand.vmem [shape: bf16[128,128], index: 5, kind: input, shape index: {}]   ;;  %s1403_s6 = inlined_call_operand.vmem [shape: f32[1,128], index: 6, kind: input, shape index: {}]   ;;  %s1404_s7 = inlined_call_operand.hbm [shape: bf16[2,128], index: 7, kind: output, shape index: {}]  }
   0x1   :  { %13 = vsyncpa [#allocation4], 0  ;;  %s1239_s24 = smov [#allocation2]   ;;  %s1191_s28 = scalar_lea.hbm %s1398_s1, 6272 }
   0x2   :  { %s21_s25 = sshll.u32 %s1239_s24, 4  ;;  %p1192_p0 = scmp.ne.s32.totalorder %s1398_s1, %s1191_s28  ;;  %s22_s25 = int_to_ptr.vmem [resolvable:$true] %s21_s25 }
   0x3   :  { %p1195_p1 = scmp.lt.u32.totalorder %s1191_s28, %s1398_s1 }
   0x5   :  { %p1197_p2 = pnand %p1195_p1, %p1192_p0 }
   0x7   :  { %1200 = shalt.err (!%p1197_p2)
}
   0x8   :  { %s1201_s10 = scalar_lea.vmem %s22_s25, 6272  ;;  %p1206_p4 = scmp.lt.s32.totalorder %s22_s25, %s22_s25 }
   0x9   :  { %p1202_p3 = scmp.ne.s32.totalorder %s22_s25, %s1201_s10  ;;  %p1207_p5 = scmp.lt.s32.totalorder %s1201_s10, %s1201_s10 }
   0xb   :  { %p1208_p6 = por %p1207_p5, %p1206_p4 }
   0xd   :  { %p1209_p7 = pnand %p1208_p6, %p1202_p3 }
   0xf   :  { %1212 = shalt.err (!%p1209_p7)
}
  0x10   :  { %s1240_s11 = smov 64   ;;  %s1241_s12 = smov 4  }
  0x11   :  { %27 = dma.hbm_to_vmem [thread:$0]  %s1398_s1, 6272, %s22_s25, [#allocation3], %s1240_s11, %s1240_s11, %s1241_s12  }
  0x12   :  { %1235 = dma.done.wait [#allocation3], 6272  }
  0x13   :  { %1236 = vsyncadd [#allocation3], 4294961024  ;;  %v1120_v0 = vld [vmem:[#allocation2 + $0x40] sm:$0xff]   ;;  %v1124_v4 = vld [vmem:[#allocation2 + $0x48] sm:$0xff]   ;;  %v1242_v21 = vmov 1983009808   ;;  %v50_v23 = vlaneseq }
  0x14   :  { %v1121_v1 = vld [vmem:[#allocation2] sm:$0xff]   ;;  %981 = vmatprep.subr.bf16.mxu0 %v1120_v0  ;;  %v1125_v5 = vld [vmem:[#allocation2 + $0x8] sm:$0xff]   ;;  %v1128_v8 = vld [vmem:[#allocation2 + $0x50] sm:$0xff]   ;;  %v48_v22 = vunpack.c.l.s4 %v1242_v21  ;;  %v1243_v45 = vmov 0.0   ;;  %vm1244_vm0 = vmmov 0   ;;  %vm492_vm1 = vcmask 130048  }
  0x15   :  { %v1122_v2 = vld [vmem:[#allocation2 + $0xc0] sm:$0xff]   ;;  %982 = vmatpush3.bf16.msra.mxu0 %v1121_v1  ;;  %v1126_v6 = vld [vmem:[#allocation2 + $0xc8] sm:$0xff]   ;;  %v1129_v9 = vld [vmem:[#allocation2 + $0x10] sm:$0xff]   ;;  %v51_v29 = vshrl.u32 %v50_v23, 7  ;;  %vm882_vm2 = vcmask 1041408  }
  0x16   :  { %v1123_v3 = vld [vmem:[#allocation2 + $0x80] sm:$0xff]   ;;  %1003 = vmatprep.subr.bf16.mxu1 %v1122_v2  ;;  %983 = vmatprep.subr.bf16.mxu0 %v1124_v4  ;;  %v1127_v7 = vld [vmem:[#allocation2 + $0x88] sm:$0xff]   ;;  %v1130_v10 = vld [vmem:[#allocation2 + $0xd0] sm:$0xff]   ;;  %v49_v28 = vunpack.c.0.s8 %v48_v22 }
  0x17   :  { %1004 = vmatpush3.bf16.msra.mxu1 %v1123_v3  ;;  %v1131_v11 = vld [vmem:[#allocation2 + $0x90] sm:$0xff]   ;;  %v1132_v12 = vld [vmem:[#allocation2 + $0x58] sm:$0xff]   ;;  %v1136_v16 = vld [vmem:[#allocation2 + $0x60] sm:$0xff]  }
  0x18   :  { %1005 = vmatprep.subr.bf16.mxu1 %v1126_v6  ;;  %v1133_v13 = vld [vmem:[#allocation2 + $0x18] sm:$0xff]   ;;  %v1137_v17 = vld [vmem:[#allocation2 + $0x20] sm:$0xff]   ;;  %v1140_v20 = vld [vmem:[#allocation2 + $0x68] sm:$0xff]   ;;  %v52_v34 = vsub.s32 %v49_v28, %v51_v29 }
  0x19   :  { %984 = vmatpush3.bf16.msra.mxu0 %v1125_v5  ;;  %v1134_v14 = vld [vmem:[#allocation2 + $0xd8] sm:$0xff]   ;;  %v1138_v18 = vld [vmem:[#allocation2 + $0xe0] sm:$0xff]   ;;  %v1141_v24 = vld [vmem:[#allocation2 + $0x28] sm:$0xff]  }
  0x1a   :  { %985 = vmatprep.subr.bf16.mxu0 %v1128_v8  ;;  %v1135_v15 = vld [vmem:[#allocation2 + $0x98] sm:$0xff]   ;;  %v1139_v19 = vld [vmem:[#allocation2 + $0xa0] sm:$0xff]   ;;  %v1142_v25 = vld [vmem:[#allocation2 + $0xe8] sm:$0xff]  }
  0x1b   :  { %1006 = vmatpush3.bf16.msra.mxu1 %v1127_v7  ;;  %v1143_v26 = vld [vmem:[#allocation2 + $0xa8] sm:$0xff]   ;;  %v1144_v27 = vld [vmem:[#allocation2 + $0x70] sm:$0xff]   ;;  %v1148_v33 = vld [vmem:[#allocation2 + $0x78] sm:$0xff]  }
  0x1c   :  { %1007 = vmatprep.subr.bf16.mxu1 %v1130_v10  ;;  %v1145_v30 = vld [vmem:[#allocation2 + $0x30] sm:$0xff]   ;;  %v1149_v35 = vld [vmem:[#allocation2 + $0x38] sm:$0xff]   ;;  %v42_v37 = vld [vmem:[%s1397_s0] sm:$0xff] }
  0x1d   :  { %986 = vmatpush3.bf16.msra.mxu0 %v1129_v9  ;;  %v1146_v31 = vld [vmem:[#allocation2 + $0xf0] sm:$0xff]   ;;  %v1150_v36 = vld [vmem:[#allocation2 + $0xf8] sm:$0xff]   ;;  %v53_v38 = vrot.slane %v42_v37, %v52_v34  ;;  %v46_v40 = vcombine.high %v42_v37, %v42_v37  ;;  %v1152_v41 = vld [vmem:[#allocation2 + $0x140] sm:$0xff]  }
  0x1e   :  { %987 = vmatprep.subr.bf16.mxu0 %v1132_v12  ;;  %v1147_v32 = vld [vmem:[#allocation2 + $0xb0] sm:$0xff]   ;;  %v1151_v39 = vld [vmem:[#allocation2 + $0xb8] sm:$0xff]   ;;  %v1154_v48 = vld [vmem:[#allocation2 + $0x100] sm:$0xff]  }
  0x1f   :  { %1008 = vmatpush3.bf16.msra.mxu1 %v1131_v11  ;;  %v61_v42 = vcombine.high %v53_v38, %v53_v38  ;;  %v60_v43 = vrot.slane %v46_v40, %v52_v34  ;;  %v86_v44 = vpack.c.bf16 %v53_v38, %v53_v38  ;;  %v1155_v50 = vld [vmem:[#allocation2 + $0x148] sm:$0xff]   ;;  %v1157_v53 = vld [vmem:[#allocation2 + $0x150] sm:$0xff]   ;;  %v1159_v55 = vld [vmem:[#allocation2 + $0x158] sm:$0xff]  }
  0x20   :  { %1009 = vmatprep.subr.bf16.mxu1 %v1134_v14  ;;  %v1156_v52 = vld [vmem:[#allocation2 + $0x108] sm:$0xff]   ;;  %v1158_v54 = vld [vmem:[#allocation2 + $0x110] sm:$0xff]   ;;  %v1160_v56 = vld [vmem:[#allocation2 + $0x118] sm:$0xff]  }
  0x21   :  { %988 = vmatpush3.bf16.msra.mxu0 %v1133_v13  ;;  %v87_v46 = vpack.c.bf16 %v61_v42, %v61_v42  ;;  %v62_v47 = vcombine.high %v60_v43, %v60_v43  ;;  %v88_v49 = vpack.c.bf16 %v60_v43, %v60_v43  ;;  %v1161_v57 = vld [vmem:[#allocation2 + $0x160] sm:$0xff]   ;;  %v43_v59 = vld [vmem:[%s1397_s0 + $0x8] sm:$0x3f]  ;;  %v1165_v5 = vld [vmem:[#allocation2 + $0x170] sm:$0xff]  }
  0x22   :  { %989 = vmatprep.subr.bf16.mxu0 %v1136_v16  ;;  %v1169_v58 = vld [vmem:[#allocation2 + $0x180] sm:$0xff]   ;;  %v63_v61 = vcombine.high %v43_v59, %v43_v59  ;;  %v70_v62 = vrot.slane %v43_v59, %v52_v34  ;;  %v1163_v63 = vld [vmem:[#allocation2 + $0x168] sm:$0xff]   ;;  %v1166_v6 = vld [vmem:[#allocation2 + $0x130] sm:$0xff]  }
  0x23   :  { %1010 = vmatpush3.bf16.msra.mxu1 %v1135_v15  ;;  %528 = vmatprep.mubr.bf16.mxu0 %v87_v46  ;;  %v89_v51 = vpack.c.bf16 %v62_v47, %v62_v47  ;;  %v1162_v60 = vld [vmem:[#allocation2 + $0x120] sm:$0xff]   ;;  %v1164_v2 = vld [vmem:[#allocation2 + $0x128] sm:$0xff]   ;;  %v1167_v7 = vld [vmem:[#allocation2 + $0x178] sm:$0xff]  }
  0x24   :  { %1011 = vmatprep.subr.bf16.mxu1 %v1138_v18  ;;  %v77_v0 = vrot.slane %v63_v61, %v52_v34  ;;  %v78_v1 = vcombine.high %v70_v62, %v70_v62  ;;  %v1168_v8 = vld [vmem:[#allocation2 + $0x138] sm:$0xff]   ;;  %v90_v9 = vpack.c.bf16 %v70_v62, %v70_v62  ;;  %v1171_v10 = vld [vmem:[%s1400_s3] sm:$0xff]   ;;  %v1172_v11 = vld [vmem:[%s1400_s3 + $0x8] sm:$0xff]  }
  0x25   :  { %990 = vmatpush3.bf16.msra.mxu0 %v1137_v17  ;;  %568 = vmatprep.mubr.bf16.mxu1 %v89_v51  ;;  %v1173_v12 = vld [vmem:[%s1400_s3 + $0x10] sm:$0xff]   ;;  %v1174_v13 = vld [vmem:[%s1400_s3 + $0x18] sm:$0xff]   ;;  %v1175_v14 = vld [vmem:[%s1400_s3 + $0x20] sm:$0xff]  }
  0x26   :  { %991 = vmatprep.subr.bf16.mxu0 %v1140_v20  ;;  %v91_v3 = vpack.c.bf16 %v78_v1, %v78_v1  ;;  %v92_v4 = vpack.c.bf16 %v77_v0, %v77_v0  ;;  %v1176_v15 = vld [vmem:[%s1400_s3 + $0x28] sm:$0xff]   ;;  %v1177_v16 = vld [vmem:[%s1400_s3 + $0x30] sm:$0xff]   ;;  %v1178_v17 = vld [vmem:[%s1400_s3 + $0x38] sm:$0xff]  }
  0x27   :  { %1012 = vmatpush3.bf16.msra.mxu1 %v1139_v19  ;;  %v1179_v18 = vld [vmem:[%s1402_s5] sm:$0xff]   ;;  %v1180_v19 = vld [vmem:[%s1402_s5 + $0x8] sm:$0xff]   ;;  %v1181_v20 = vld [vmem:[%s1402_s5 + $0x10] sm:$0xff]  }
  0x28   :  { %1013 = vmatprep.subr.bf16.mxu1 %v1142_v25  ;;  %v1182_v21 = vld [vmem:[%s1402_s5 + $0x18] sm:$0xff]   ;;  %v1183_v22 = vld [vmem:[%s1402_s5 + $0x20] sm:$0xff]   ;;  %v1184_v23 = vld [vmem:[%s1402_s5 + $0x28] sm:$0xff]  }
  0x29   :  { %992 = vmatpush3.bf16.msra.mxu0 %v1141_v24  ;;  %v912_v25 = vld [vmem:[%s1399_s2] ss:$0 sm:$0xff]  ;;  %v1185_v51 = vld [vmem:[%s1402_s5 + $0x30] sm:$0xff]  }
  0x2a   :  { %993 = vmatprep.subr.bf16.mxu0 %v1144_v27 }
  0x2b   :  { %1014 = vmatpush3.bf16.msra.mxu1 %v1143_v26 }
  0x2c   :  { %1015 = vmatprep.subr.bf16.mxu1 %v1146_v31 }
  0x2d   :  { %994 = vmatpush3.bf16.msra.mxu0 %v1145_v30 }
  0x2e   :  { %995 = vmatprep.subr.bf16.mxu0 %v1148_v33 }
  0x2f   :  { %1016 = vmatpush3.bf16.msra.mxu1 %v1147_v32 }
  0x30   :  { %1017 = vmatprep.subr.bf16.mxu1 %v1150_v36 }
  0x31   :  { %996 = vmatpush3.bf16.msra.mxu0 %v1149_v35 }
  0x32   :  { %1025 = vmatprep.subr.bf16.mxu0 %v1152_v41 }
  0x33   :  { %1018 = vmatpush3.bf16.msra.mxu1 %v1151_v39 }
  0x34   :  { %1067 = vmatprep.subr.bf16.mxu1 %v1243_v45  ;;  %529 = vmatmul.mubr.bf16.vlgmr.msra.gmra.mrb[0].mxu0 %v86_v44 }
  0x35   :  { %1026 = vmatpush3.bf16.msra.mxu0 %v1154_v48  ;;  %608 = vmatprep.mubr.bf16.mxu0 %v91_v3 }
  0x36   :  { %569 = vmatmul.mubr.bf16.vlgmr.msra.gmra.mrb[0].mxu1 %v88_v49  ;;  %1027 = vmatprep.subr.bf16.mxu0 %v1155_v50 }
  0x37   :  { %1069 = vmatprep.mubr.msk.bf16.mxu1 %vm1244_vm0, %v1243_v45  ;;  %1068 = vmatpush3.bf16.msra.mxu1 %v1169_v58 }
  0x38   :  { %1073 = vmatprep.subr.bf16.mxu1 %v1243_v45 }
  0x39   :  { %1028 = vmatpush3.bf16.msra.mxu0 %v1156_v52  ;;  %v1186_v52 = vld [vmem:[%s1402_s5 + $0x38] sm:$0xff]  }
  0x3a   :  { %1029 = vmatprep.subr.bf16.mxu0 %v1157_v53  ;;  %v963_v53 = vld [vmem:[%s1401_s4] ss:$0 sm:$0xff]  ;;  %s1245_s4 = smov [#allocation5]  }
  0x3b   :  { %s903_s5 = sshll.u32 %s1245_s4, 4  ;;  %s904_s5 = int_to_ptr.vmem [resolvable:$true] %s903_s5 }
  0x3c   :  { %s1217_s28 = scalar_lea.vmem %s904_s5, 32  ;;  %p1218_p9 = scmp.lt.s32.totalorder %s904_s5, %s904_s5 }
  0x3d   :  { %1030 = vmatpush3.bf16.msra.mxu0 %v1158_v54 }
  0x3e   :  { %1031 = vmatprep.subr.bf16.mxu0 %v1159_v55  ;;  %1070 = vmatmul.mubr.msk.bf16.vlgmr.msra.gmra.mrb[4].mxu1 %vm492_vm1, %v92_v4 }
  0x3f   :  { %1089 = vmatprep.mubr.msk.bf16.mxu1 %vm1244_vm0, %v1243_v45  ;;  %1074 = vmatpush3.bf16.msra.mxu1 %v1171_v10 }
  0x40   :  { %1075 = vmatprep.subr.bf16.mxu1 %v1243_v45 }
  0x41   :  { %1032 = vmatpush3.bf16.msra.mxu0 %v1160_v56 }
  0x42   :  { %1033 = vmatprep.subr.bf16.mxu0 %v1161_v57 }
  0x43   :  { %1076 = vmatpush3.bf16.msra.mxu1 %v1172_v11 }
  0x44   :  { %1077 = vmatprep.subr.bf16.mxu1 %v1243_v45 }
  0x45   :  { %1034 = vmatpush3.bf16.msra.mxu0 %v1162_v60 }
  0x46   :  { %1035 = vmatprep.subr.bf16.mxu0 %v1163_v63 }
  0x47   :  { %1078 = vmatpush3.bf16.msra.mxu1 %v1173_v12 }
  0x48   :  { %1079 = vmatprep.subr.bf16.mxu1 %v1243_v45 }
  0x49   :  { %1036 = vmatpush3.bf16.msra.mxu0 %v1164_v2 }
  0x4a   :  { %1037 = vmatprep.subr.bf16.mxu0 %v1165_v5 }
  0x4b   :  { %1080 = vmatpush3.bf16.msra.mxu1 %v1174_v13 }
  0x4c   :  { %1081 = vmatprep.subr.bf16.mxu1 %v1243_v45 }
  0x4d   :  { %1038 = vmatpush3.bf16.msra.mxu0 %v1166_v6 }
  0x4e   :  { %1039 = vmatprep.subr.bf16.mxu0 %v1167_v7 }
  0x4f   :  { %1082 = vmatpush3.bf16.msra.mxu1 %v1175_v14 }
  0x50   :  { %1083 = vmatprep.subr.bf16.mxu1 %v1243_v45 }
  0x51   :  { %1040 = vmatpush3.bf16.msra.mxu0 %v1168_v8 }
  0x52   :  { %1093 = vmatprep.subr.bf16.mxu0 %v1243_v45 }
  0x53   :  { %1084 = vmatpush3.bf16.msra.mxu1 %v1176_v15 }
  0x54   :  { %609 = vmatmul.mubr.bf16.vlgmr.msra.gmra.mrb[4].mxu0 %v90_v9  ;;  %1085 = vmatprep.subr.bf16.mxu1 %v1243_v45 }
  0x55   :  { %1109 = vmatprep.mubr.msk.bf16.mxu0 %vm1244_vm0, %v1243_v45  ;;  %1094 = vmatpush3.bf16.msra.mxu0 %v1179_v18 }
  0x56   :  { %1095 = vmatprep.subr.bf16.mxu0 %v1243_v45 }
  0x57   :  { %1086 = vmatpush3.bf16.msra.mxu1 %v1177_v16 }
  0x58   :  { %1087 = vmatprep.subr.bf16.mxu1 %v1243_v45 }
  0x59   :  { %1096 = vmatpush3.bf16.msra.mxu0 %v1180_v19 }
  0x5a   :  { %1097 = vmatprep.subr.bf16.mxu0 %v1243_v45 }
  0x5b   :  { %1088 = vmatpush3.bf16.msra.mxu1 %v1178_v17 }
  0x5d   :  { %1098 = vmatpush3.bf16.msra.mxu0 %v1181_v20 }
  0x5e   :  { %1099 = vmatprep.subr.bf16.mxu0 %v1243_v45 }
  0x61   :  { %1100 = vmatpush3.bf16.msra.mxu0 %v1182_v21 }
  0x62   :  { %1101 = vmatprep.subr.bf16.mxu0 %v1243_v45 }
  0x65   :  { %1102 = vmatpush3.bf16.msra.mxu0 %v1183_v22 }
  0x66   :  { %1103 = vmatprep.subr.bf16.mxu0 %v1243_v45 }
  0x69   :  { %1104 = vmatpush3.bf16.msra.mxu0 %v1184_v23 }
  0x6a   :  { %1105 = vmatprep.subr.bf16.mxu0 %v1243_v45 }
  0x6d   :  { %1106 = vmatpush3.bf16.msra.mxu0 %v1185_v51 }
  0x6e   :  { %1107 = vmatprep.subr.bf16.mxu0 %v1243_v45  ;;  %v972_v45 = vld [vmem:[%s1403_s6] ss:$0 sm:$0xff]  ;;  %s1213_s6 = scalar_lea.vmem %s904_s5, 16 }
  0x6f   :  { %p1214_p8 = scmp.ne.s32.totalorder %s904_s5, %s1213_s6  ;;  %p1219_p10 = scmp.lt.s32.totalorder %s1217_s28, %s1213_s6 }
  0x71   :  { %1108 = vmatpush3.bf16.msra.mxu0 %v1186_v52  ;;  %p1220_p11 = por %p1219_p10, %p1218_p9 }
  0x73   :  { %p1221_p12 = pnand %p1220_p11, %p1214_p8 }
 0x107   :  { %v997_v24 = vpop.f32.mrb[0].mxu0 }
 0x108   :  { %v998_v26 = vpop.f32.mrb[1].mxu0 }
 0x109   :  { %v999_v27 = vadd.f32 %v998_v26, %v997_v24  ;;  %v1000_v28 = vpop.f32.mrb[2].mxu0  ;;  %v1019_v29 = vpop.f32.mrb[0].mxu1 }
 0x10a   :  { %v1001_v30 = vpop.f32.mrb[3].mxu0  ;;  %v1020_v31 = vpop.f32.mrb[1].mxu1 }
 0x10b   :  { %v531_v32 = vadd.f32 %v999_v27, %v912_v25  ;;  %v1021_v33 = vadd.f32 %v1020_v31, %v1019_v29  ;;  %v1022_v34 = vpop.f32.mrb[2].mxu1 }
 0x10c   :  { %v1023_v35 = vpop.f32.mrb[3].mxu1 }
 0x10d   :  { %v571_v36 = vadd.f32 %v1021_v33, %v531_v32 }
 0x111   :  { %v650_v37 = vpop.f32.mrb[4].mxu1 }
 0x112   :  { %v1071_v38 = vpop.f32.mrb[5].mxu1 }
 0x113   :  { %v653_v39 = vpop.f32.mrb[6].mxu1 }
 0x114   :  { %v1072_v40 = vpop.f32.mrb[7].mxu1 }
 0x127   :  { %v1041_v41 = vpop.f32.mrb[4].mxu0 }
 0x128   :  { %v1042_v42 = vpop.f32.mrb[5].mxu0 }
 0x129   :  { %v1043_v43 = vadd.f32 %v1042_v42, %v1041_v41  ;;  %v1044_v44 = vpop.f32.mrb[6].mxu0 }
 0x12a   :  { %v1045_v46 = vpop.f32.mrb[7].mxu0 }
 0x12b   :  { %v611_v47 = vadd.f32 %v1043_v43, %v571_v36 }
 0x12d   :  { %v651_v48 = vadd.f32 %v650_v37, %v611_v47 }
 0x12f   :  { %v656_v49 = vmax.f32 %v651_v48, 0.0 }
 0x131   :  { %v657_v50 = vpack.c.bf16 %v656_v49, %v656_v49 }
 0x133   :  { %1090 = vmatmul.mubr.bf16.vlgmr.msra.gmra.mrb[8].mxu1 %v657_v50 }
 0x206   :  { %v763_v54 = vpop.f32.mrb[8].mxu1 }
 0x207   :  { %v764_v55 = vadd.f32 %v963_v53, %v763_v54  ;;  %v1091_v56 = vpop.f32.mrb[9].mxu1 }
 0x208   :  { %v766_v57 = vpop.f32.mrb[10].mxu1 }
 0x209   :  { %v769_v58 = vmax.f32 %v764_v55, 0.0  ;;  %v1092_v59 = vpop.f32.mrb[11].mxu1 }
 0x20b   :  { %v770_v60 = vpack.c.bf16 %v769_v58, %v769_v58 }
 0x20d   :  { %1110 = vmatmul.mubr.bf16.vlgmr.msra.gmra.mrb[8].mxu0 %v770_v60 }
 0x2e0   :  { %v876_v61 = vpop.f32.mrb[8].mxu0 }
 0x2e1   :  { %v877_v62 = vadd.f32 %v972_v45, %v876_v61  ;;  %v1111_v63 = vpop.f32.mrb[9].mxu0 }
 0x2e2   :  { %v879_v0 = vpop.f32.mrb[10].mxu0 }
 0x2e3   :  { %v1112_v1 = vpop.f32.mrb[11].mxu0  ;;  %v883_v2 = vsel %vm882_vm2, %v877_v62, -inf }
 0x2e4   :  { %884 = vmax.xlane.f32.xlu0 %v883_v2 }
 0x371   :  { %v885_v3 = vpop.xlane.xlu0 %884 }
 0x372   :  { %v886_v4 = vsub.f32 %v877_v62, %v885_v3 }
 0x374   :  { %v887_v5 = vmul.f32 1.442695, %v886_v4 }
 0x376   :  { %1187 = vpow2.f32 %v887_v5 }
 0x380   :  { %v1188_v6 = vpop.eup %1187 }
 0x381   :  { %v889_v7 = vsel %vm882_vm2, %v1188_v6, 0.0 }
 0x382   :  { %890 = vadd.xlane.f32.xlu0 %v889_v7 }
 0x40f   :  { %v891_v8 = vpop.xlane.xlu0 %890 }
 0x410   :  { %1189 = vlog2.f32 %v891_v8 }
 0x41a   :  { %v1190_v9 = vpop.eup %1189 }
 0x41b   :  { %v893_v10 = vmul.f32 0.6931472, %v1190_v9 }
 0x41d   :  { %v894_v11 = vsub.f32 %v886_v4, %v893_v10 }
 0x41f   :  { %v895_v12 = vpack.c.bf16 %v894_v11, %v894_v11 }
 0x421   :  { %896 = vst [vmem:[#allocation5] sm:$0x1] %v895_v12 }
 0x422   :  { %1224 = shalt.err (!%p1221_p12)
}
 0x423   :  { %s1225_s8 = scalar_lea.hbm %s1404_s7, 16 }
 0x424   :  { %p1226_p13 = scmp.ne.s32.totalorder %s1404_s7, %s1225_s8  ;;  %p1229_p0 = scmp.lt.u32.totalorder %s1225_s8, %s1404_s7 }
 0x426   :  { %p1231_p1 = pnand %p1229_p0, %p1226_p13 }
 0x428   :  { %1234 = shalt.err (!%p1231_p1)
}
 0x429   :  { %906 = dma.vmem_to_hbm [thread:$0]  %s904_s5, 16, %s1404_s7, [#allocation4]  }
 0x42a   :  { %1237 = dma.done.wait [#allocation4], 16  }
 0x42b   :  { %1238 = vsyncadd [#allocation4], 4294967280 }
 0x42c   :  { %910 = vsyncpa [#allocation3], 1 }
 0x42d   :  { %911 = vsyncpa [#allocation4], 1 }

</bundles_post_ra>
